<compile_context>
chip_gen: v7x
topology: tpu7x:2x2x1
jax: 0.10.0
libtpu: 0.0.40
codegen_flags: <defaults>
</compile_context>

<pallas_src>
import numpy as np

import jax
import jax.numpy as jnp
from jax import lax
from jax.experimental import pallas as pl
from jax.experimental.pallas import tpu as pltpu


# --------------------------- filter construction ---------------------------- #

def _gauss_1d(scale):
    """Normalized 1-D Gaussian identical to the PyTorch buffer's 1-D factor."""
    sigma = (1.0 / scale - 1.0) / 2.0
    ksize = 2 * int(round(sigma * 4)) + 1
    xs = np.arange(ksize, dtype=np.float64)
    mean = (ksize - 1) / 2.0
    g = np.exp(-((xs - mean) ** 2) / (2.0 * sigma ** 2))
    g = g / g.sum()
    return g.astype(np.float64), ksize // 2


def _band_matrix(length, scale):
    """Matrix A (Lo, L) s.t. A @ v == (pad(v, ka/kb) *conv* g)[::int(1/scale)]."""
    g, ka = _gauss_1d(scale)
    k = g.shape[0]
    s = int(1.0 / scale)                 # matches int(inv_scale) in the module
    lo = -(-length // s)                 # ceil(L / s) == len(range(0, L, s))
    a = np.zeros((lo, length), dtype=np.float32)
    for i in range(lo):
        base = i * s - ka
        for t in range(k):
            r = base + t
            if 0 <= r < length:
                a[i, r] += g[t]
    return a


# ------------------------------ Pallas kernel ------------------------------- #

def _aa_kernel(x_ref, awt_ref, ah_ref, o_ref, acc_ref):
    """Fused pad + separable Gaussian conv + subsample for a tile of planes.

    x_ref:   (Bt, Th, W)   input planes tile (native dtype), Th-slice of H
    awt_ref: (W, Wo)       width band matrix, transposed
    ah_ref:  (Ho, Th)      height band matrix slice for this H tile
    o_ref:   (Bt, Ho, Wo)  output planes
    acc_ref: (Bt, Ho, Wo)  f32 accumulator over H tiles
    """
    hj = pl.program_id(1)

    @pl.when(hj == 0)
    def _():
        acc_ref[...] = jnp.zeros_like(acc_ref)

    bt, th, w = x_ref.shape
    wo = awt_ref.shape[1]

    # Cast to f32 happens on the VMEM tile (input DMA stays in native dtype).
    x = x_ref[...].astype(jnp.float32)

    # Stage 1: Gaussian conv + subsample along W -> plain 2-D MXU matmul.
    # (Th is a multiple of 8 or the full H, so the reshape is layout-free.)
    t = jnp.dot(x.reshape(bt * th, w), awt_ref[...],
                preferred_element_type=jnp.float32)
    t = t.reshape(bt, th, wo)

    # Stage 2: Gaussian conv + subsample along H, contracting the shared 2-D
    # band matrix directly (no Bt-sized broadcast of A_h), accumulated over
    # H tiles in f32.
    acc_ref[...] += jnp.einsum('oh,bhw->bow', ah_ref[...], t,
                               preferred_element_type=jnp.float32)

    @pl.when(hj == pl.num_programs(1) - 1)
    def _():
        o_ref[...] = acc_ref[...].astype(o_ref.dtype)


# ----------------------------- tiling heuristics ----------------------------- #

def _chip_budgets():
    """(vmem_limit_bytes, target input-block bytes) per TPU generation."""
    cap = None
    try:
        info = pltpu.get_tpu_info()
        cap = getattr(info, "vmem_capacity_bytes", None)
    except Exception:
        cap = None
    if cap is None or cap <= 96 * 1024 * 1024:
        # v7x-class (64 MiB VMEM per TensorCore) or unknown: be conservative.
        return 48 * 1024 * 1024, 3 * 1024 * 1024
    # v5e / v6e: 128 MiB physical VMEM -> big blocks amortize per-step overhead.
    return 96 * 1024 * 1024, 8 * 1024 * 1024


def _pick_h_tile(h, row_bytes, target_bytes):
    """H tile (stage-2 contraction axis). Must be h or a multiple of 128
    dividing h (A_h lane dim + layout-free reshapes)."""
    if h * row_bytes <= target_bytes:
        return h
    divs = [d for d in range(128, h, 128) if h % d == 0]
    if not divs:
        # TODO(synk): pad H in the wrapper for huge non-128-divisible heights.
        return h
    fitting = [d for d in divs if d * row_bytes <= target_bytes]
    return max(fitting) if fitting else min(divs)


def _pick_block_planes(nc, block_plane_bytes, target_bytes):
    """Planes per grid step: as large as the byte budget allows, but always
    leaving >=2 grid steps (so the 'parallel' axis feeds both v7x cores)."""
    bt = max(1, target_bytes // max(block_plane_bytes, 1))
    bt = min(bt, nc, 1024)
    if nc >= 2:
        bt = min(bt, -(-nc // 2))        # ceil(nc/2) -> >= 2 grid steps
    if bt > 8:
        bt = (bt // 8) * 8               # sublane-friendly block leading dim
    return max(int(bt), 1)


# ------------------------------ module wrapper ------------------------------ #

def anti_alias_interpolation2d(x_nchw, scale, *, block_planes=None, h_tile=None):
    """Forward pass of AntiAliasInterpolation2d for an NCHW input."""
    if scale == 1.0:
        return x_nchw

    n, c, h, w = x_nchw.shape
    ah = jnp.asarray(_band_matrix(h, scale))       # (Ho, H)
    aw = jnp.asarray(_band_matrix(w, scale))       # (Wo, W)
    awt = aw.T                                     # (W, Wo)
    ho, wo = ah.shape[0], aw.shape[0]

    nc = n * c
    x3 = x_nchw.reshape(nc, h, w)                  # native dtype, no upcast

    vmem_limit, target_bytes = _chip_budgets()
    itemsize = jnp.dtype(x_nchw.dtype).itemsize

    if h_tile is None:
        th = _pick_h_tile(h, w * itemsize, target_bytes)
    else:
        assert h % h_tile == 0 and (h_tile == h or h_tile % 128 == 0), (h, h_tile)
        th = h_tile

    if block_planes is None:
        bt = _pick_block_planes(nc, th * w * itemsize, target_bytes)
    else:
        bt = int(block_planes)

    grid = (pl.cdiv(nc, bt), h // th)              # ragged last plane block OK

    out = pl.pallas_call(
        _aa_kernel,
        out_shape=jax.ShapeDtypeStruct((nc, ho, wo), x_nchw.dtype),
        grid=grid,
        in_specs=[
            pl.BlockSpec((bt, th, w), lambda i, j: (i, j, 0)),
            pl.BlockSpec((w, wo), lambda i, j: (0, 0)),
            pl.BlockSpec((ho, th), lambda i, j: (0, j)),
        ],
        out_specs=pl.BlockSpec((bt, ho, wo), lambda i, j: (i, 0, 0)),
        scratch_shapes=[pltpu.VMEM((bt, ho, wo), jnp.float32)],
        compiler_params=pltpu.CompilerParams(
            dimension_semantics=("parallel", "arbitrary"),
            vmem_limit_bytes=vmem_limit),
    )(x3, awt, ah)

    return out.reshape(n, c, ho, wo)


# ---------------------------- pure-JAX reference ----------------------------- #

def ref_forward(x_nchw, scale):
    """Direct mirror of the PyTorch forward: pad -> depthwise conv2d -> ::s."""
    if scale == 1.0:
        return x_nchw
    n, c, h, w = x_nchw.shape
    g, ka = _gauss_1d(scale)
    kb = ka
    k2 = np.outer(g, g)
    k2 = (k2 / k2.sum()).astype(np.float32)
    s = int(1.0 / scale)

    xp = jnp.pad(x_nchw.astype(jnp.float32),
                 ((0, 0), (0, 0), (ka, kb), (ka, kb)))
    wgt = jnp.tile(jnp.asarray(k2)[None, None], (c, 1, 1, 1))   # (C,1,K,K) OIHW
    y = lax.conv_general_dilated(
        xp, wgt, (1, 1), 'VALID',
        dimension_numbers=('NCHW', 'OIHW', 'NCHW'),
        feature_group_count=c)
    return y[:, :, ::s, ::s].astype(x_nchw.dtype)


# ----------------------------------- main ------------------------------------ #

if __name__ == "__main__":
    key = jax.random.PRNGKey(0)
    k1, k2, k3 = jax.random.split(key, 3)

    # Small shapes consistent with the module (batch=2, channels=4, spatial=16).
    x = jax.random.normal(k1, (2, 4, 16, 16), jnp.float32)
    for scale in (0.5, 0.25, 1.0):
        out = jax.block_until_ready(anti_alias_interpolation2d(x, scale))
        ref = jax.block_until_ready(ref_forward(x, scale))
        assert out.shape == ref.shape, (scale, out.shape, ref.shape)
        assert bool(jnp.all(jnp.isfinite(out)))
        assert jnp.allclose(out, ref, rtol=1e-3, atol=1e-4), (
            scale, float(jnp.max(jnp.abs(out - ref))))

    # Multi-step, ragged (cdiv) plane grid: 16 planes with blocks of 3.
    x2 = jax.random.normal(k2, (2, 8, 32, 32), jnp.float32)
    out2 = jax.block_until_ready(
        anti_alias_interpolation2d(x2, 0.25, block_planes=3))
    ref2 = jax.block_until_ready(ref_forward(x2, 0.25))
    assert out2.shape == ref2.shape
    assert jnp.allclose(out2, ref2, rtol=1e-3, atol=1e-4), (
        float(jnp.max(jnp.abs(out2 - ref2))))

    # H-tiled path: stage-2 accumulation across the "arbitrary" grid axis.
    xh = jax.random.normal(k3, (1, 2, 256, 128), jnp.float32)
    out3 = jax.block_until_ready(
        anti_alias_interpolation2d(xh, 0.25, block_planes=1, h_tile=128))
    ref3 = jax.block_until_ready(ref_forward(xh, 0.25))
    assert out3.shape == ref3.shape
    assert jnp.allclose(out3, ref3, rtol=1e-3, atol=1e-4), (
        float(jnp.max(jnp.abs(out3 - ref3))))

    print("KERNEL_OK")
</pallas_src>

<mosaic_0001>
module attributes {stable_mosaic.version = 11 : i64} {
  func.func @_aa_kernel(%arg0: i32, %arg1: i32, %arg2: memref<4x16x16xf32, #tpu.memory_space<vmem>>, %arg3: memref<16x8xf32, #tpu.memory_space<vmem>>, %arg4: memref<8x16xf32, #tpu.memory_space<vmem>>, %arg5: memref<4x8x8xf32, #tpu.memory_space<vmem>>, %arg6: memref<4x8x8xf32, #tpu.memory_space<vmem>>) attributes {dimension_semantics = [#tpu.dimension_semantics<parallel>, #tpu.dimension_semantics<arbitrary>], iteration_bounds = array<i64: 2, 1>, scalar_prefetch = 0 : i64, scratch_operands = 1 : i64, tpu.core_type = #tpu.core_type<tc>, window_params = [{transform_indices = @transform_0, window_bounds = array<i64: 4, 16, 16>}, {pipeline_mode = #tpu.pipeline_mode<synchronous>, transform_indices = @transform_1, window_bounds = array<i64: 16, 8>}, {transform_indices = @transform_2, window_bounds = array<i64: 8, 16>}, {transform_indices = @transform_3, window_bounds = array<i64: 4, 8, 8>}]} {
    %c0_i32 = arith.constant 0 : i32
    %0 = arith.cmpi eq, %arg1, %c0_i32 : i32
    %1 = arith.extui %0 : i1 to i32
    %c0_i32_0 = arith.constant 0 : i32
    %2 = arith.cmpi ne, %1, %c0_i32_0 : i32
    scf.if %2 {
      %cst_16 = arith.constant 0.000000e+00 : f32
      %17 = vector.broadcast %cst_16 : f32 to vector<4x8x8xf32>
      %c0_17 = arith.constant 0 : index
      %c0_18 = arith.constant 0 : index
      %c0_19 = arith.constant 0 : index
      %18 = vector.load %arg6[%c0_17, %c0_18, %c0_19] : memref<4x8x8xf32, #tpu.memory_space<vmem>>, vector<4x8x8xf32>
      tpu.vector_store %arg6[%c0_17, %c0_18, %c0_19], %17 {strides = array<i32>} : memref<4x8x8xf32, #tpu.memory_space<vmem>>, vector<4x8x8xf32>,
    } else {
    }
    %c0 = arith.constant 0 : index
    %c0_1 = arith.constant 0 : index
    %c0_2 = arith.constant 0 : index
    %3 = vector.load %arg2[%c0, %c0_1, %c0_2] : memref<4x16x16xf32, #tpu.memory_space<vmem>>, vector<4x16x16xf32>
    %4 = vector.shape_cast %3 : vector<4x16x16xf32> to vector<64x16xf32>
    %c0_3 = arith.constant 0 : index
    %c0_4 = arith.constant 0 : index
    %5 = vector.load %arg3[%c0_3, %c0_4] : memref<16x8xf32, #tpu.memory_space<vmem>>, vector<16x8xf32>
    %cst = arith.constant dense<0.000000e+00> : vector<64x8xf32>
    %6 = tpu.matmul %4, %5, %cst {dimension_numbers = #tpu.dot_dimension_numbers<[1], [0], [0], [1], [0, 0, 1, 1], [], []>} : vector<64x16xf32>, vector<16x8xf32>, vector<64x8xf32> -> vector<64x8xf32>
    %7 = vector.shape_cast %6 : vector<64x8xf32> to vector<4x16x8xf32>
    %c0_5 = arith.constant 0 : index
    %c0_6 = arith.constant 0 : index
    %c0_7 = arith.constant 0 : index
    %8 = vector.load %arg6[%c0_5, %c0_6, %c0_7] : memref<4x8x8xf32, #tpu.memory_space<vmem>>, vector<4x8x8xf32>
    %c0_8 = arith.constant 0 : index
    %c0_9 = arith.constant 0 : index
    %9 = vector.load %arg4[%c0_8, %c0_9] : memref<8x16xf32, #tpu.memory_space<vmem>>, vector<8x16xf32>
    "tpu.trace_start"() <{level = 10 : i32, message = "oh,bhw->bow"}> : () -> ()
    %cst_10 = arith.constant dense<0.000000e+00> : vector<4x8x8xf32>
    %10 = tpu.matmul %7, %9, %cst_10 {dimension_numbers = #tpu.dot_dimension_numbers<[1], [1], [0, 2], [0], [0, 0, 0, 2, 1, 0], [], []>} : vector<4x16x8xf32>, vector<8x16xf32>, vector<4x8x8xf32> -> vector<4x8x8xf32>
    %11 = tpu.transpose %10, [0, 2, 1] : vector<4x8x8xf32> -> vector<4x8x8xf32>
    "tpu.trace_stop"() : () -> ()
    %12 = arith.addf %8, %11 : vector<4x8x8xf32>
    %c0_11 = arith.constant 0 : index
    %c0_12 = arith.constant 0 : index
    %c0_13 = arith.constant 0 : index
    %13 = vector.load %arg6[%c0_11, %c0_12, %c0_13] : memref<4x8x8xf32, #tpu.memory_space<vmem>>, vector<4x8x8xf32>
    tpu.vector_store %arg6[%c0_11, %c0_12, %c0_13], %12 {strides = array<i32>} : memref<4x8x8xf32, #tpu.memory_space<vmem>>, vector<4x8x8xf32>,
    %c0_i32_14 = arith.constant 0 : i32
    %14 = arith.cmpi eq, %arg1, %c0_i32_14 : i32
    %15 = arith.extui %14 : i1 to i32
    %c0_i32_15 = arith.constant 0 : i32
    %16 = arith.cmpi ne, %15, %c0_i32_15 : i32
    scf.if %16 {
      %c0_16 = arith.constant 0 : index
      %c0_17 = arith.constant 0 : index
      %c0_18 = arith.constant 0 : index
      %17 = vector.load %arg6[%c0_16, %c0_17, %c0_18] : memref<4x8x8xf32, #tpu.memory_space<vmem>>, vector<4x8x8xf32>
      %c0_19 = arith.constant 0 : index
      %c0_20 = arith.constant 0 : index
      %c0_21 = arith.constant 0 : index
      %18 = vector.load %arg5[%c0_19, %c0_20, %c0_21] : memref<4x8x8xf32, #tpu.memory_space<vmem>>, vector<4x8x8xf32>
      tpu.vector_store %arg5[%c0_19, %c0_20, %c0_21], %17 {strides = array<i32>} : memref<4x8x8xf32, #tpu.memory_space<vmem>>, vector<4x8x8xf32>,
    } else {
    }
    return
  }
  func.func @transform_0(%arg0: i32, %arg1: i32) -> (i32, i32, i32) {
    %c0_i32 = arith.constant 0 : i32
    %c0_i32_0 = arith.constant 0 : i32
    return %arg0, %arg1, %c0_i32 : i32, i32, i32
  }
  func.func @transform_1(%arg0: i32, %arg1: i32) -> (i32, i32) {
    %c0_i32 = arith.constant 0 : i32
    %c0_i32_0 = arith.constant 0 : i32
    %c0_i32_1 = arith.constant 0 : i32
    return %c0_i32, %c0_i32_0 : i32, i32
  }
  func.func @transform_2(%arg0: i32, %arg1: i32) -> (i32, i32) {
    %c0_i32 = arith.constant 0 : i32
    %c0_i32_0 = arith.constant 0 : i32
    return %c0_i32, %arg1 : i32, i32
  }
  func.func @transform_3(%arg0: i32, %arg1: i32) -> (i32, i32, i32) {
    %c0_i32 = arith.constant 0 : i32
    %c0_i32_0 = arith.constant 0 : i32
    %c0_i32_1 = arith.constant 0 : i32
    return %arg0, %c0_i32, %c0_i32_0 : i32, i32, i32
  }
}

</mosaic_0001>

<bundles_post_ra>
// kernel: tpu_custom_call.1
= control target key start
LH: loop header
LB: loop body
LE: loop exit
PB: predicated region body
PF: predicated region fallthrough
CT: control target
= control target key end

     0   :  { %8 = vsyncpa [#allocation4], 0  ;;  %s1366_s0 = inlined_call_operand.hbm [shape: f32[8,16,16], index: 0, kind: input, shape index: {}]   ;;  %s1367_s1 = inlined_call_operand.vmem [shape: f32[16,8], index: 1, kind: input, shape index: {}]   ;;  %s1368_s2 = inlined_call_operand.vmem [shape: f32[8,16], index: 2, kind: input, shape index: {}]   ;;  %s1369_s3 = inlined_call_operand.hbm [shape: f32[8,8,8], index: 3, kind: output, shape index: {}]  }
   0x1   :  { %10 = vsyncpa [#allocation4 + $0x1], 0 }
   0x2   :  { %11 = vsyncpa [#allocation5], 0 }
   0x3   :  { %13 = vsyncpa [#allocation5 + $0x1], 0  ;;  %s1155_s12 = smov 0   ;;  %s1157_s13 = smov 0  }
   0x4   :  { %s1159_s14 = smov 0   ;;  %s1161_s15 = smov 0  }
   0x5   :  { %s1163_s16 = smov 0   ;;  %s1165_s17 = smov 0  }
   0x6 LB: > { %s869_s18 = sadd.s32 4294967295, %s1126_s17   ;;  %s870_s19 = sadd.s32 4294967294, %s1126_s17   ;;  %s1126_s17 = sphi %s1165_s17, %s19_s17   ;;  %s1122_s16 = sphi %s1163_s16, %s1384_s16   ;;  %s1118_s15 = sphi %s1161_s15, %s1383_s15   ;;  %s1114_s14 = sphi %s1159_s14, %s1382_s14   ;;  %s1110_s13 = sphi %s1157_s13, %s1381_s13   ;;  %s1106_s12 = sphi %s1155_s12, %s1380_s12  }
   0x7   : > { %s31_s20 = sadd.s32 1, %s1122_s16  ;;  %s40_s21 = sadd.s32 1, %s1114_s14 }
   0x8   : > { %p33_p0 = scmp.ge.s32.totalorder %s31_s20, 2  ;;  %p47_p1 = scmp.ne.s32.totalorder %s1114_s14, %s1110_s13 }
   0x9   : > { %p48_p2 = scmp.eq.s32.totalorder %s1126_s17, 0  ;;  %p53_p3 = scmp.ne.s32.totalorder %s1110_s13, %s1106_s12 }
   0xa   : > { %s1386_s20 = smov (%p33_p0, %s31_s20), 0  ;;  %p54_p5 = scmp.eq.s32.totalorder %s869_s18, 0 }
   0xb   : > { %p1196_p4 = por %p48_p2, %p47_p1  ;;  %s35_s23 = ssub.s32 %s1122_s16, %s1386_s20 }
   0xc   : > { %p124_p6 = scmp.eq.s32.totalorder %s869_s18, 1  ;;  %p38_p7 = scmp.eq.s32.totalorder %s35_s23, 0 }
   0xd   : > { %p1202_p8 = por %p54_p5, %p53_p3  ;;  %p130_p10 = scmp.eq.s32.totalorder %s870_s19, 1 }
   0xe   : > { %p1206_p9 = por %p124_p6, %p47_p1  ;;  %p959_p13 = scmp.lt.s32.totalorder %s1126_s17, 2 }
   0xf   : > { %s1211_s26 = scalar_select %p38_p7, %s1114_s14, %s40_s21  }
  0x10   : > { %s1373_s25 = scalar_select %p1206_p9, 1, 0 }
  0x11   : > { %p1213_p11 = por %p130_p10, %p53_p3  ;;  %s160_s28 = sand.u32 1, %s1114_s14  }
  0x12   : > { %s874_s29 = sshll.u32 %s160_s28, 6  ;;  %s900_s30 = sshll.u32 %s1122_s16, 10 }
  0x13   : > { %s1374_s27 = scalar_select %p1213_p11, 1, 0 }
  0x14   : > { %s1224_s6 = scalar_lea.hbm %s1366_s0, %s900_s30  ;;  %s164_s7 = scalar_lea.vmem [#allocation3], %s874_s29 }
  0x15   : > { %s174_s8 = sshll.u32 %s164_s7, 4  ;;  %p1230_p0 = pnand %p959_p13, %p1196_p4  ;;  %s1226_s8 = int_to_ptr.vmem [resolvable:$true] %s174_s8 }
  0x16   : > { %s1235_s10 = scalar_lea.sflag [#allocation4], %s160_s28  ;;  %s1014_s11 = scalar_lea.hbm %s1224_s6, 1024 }
  0x17   : > { %p1015_p2 = scmp.ne.s32.totalorder %s1224_s6, %s1014_s11  ;;  %p1016_p3 = pneg %p1230_p0 }
  0x18   : > { %s1019_s21 = scalar_lea.hbm %s1366_s0, 2048  ;;  %p1020_p4 = scmp.lt.u32.totalorder %s1224_s6, %s1366_s0 }
  0x19   : > { %p1017_p5 = pnand %p1016_p3, %p1015_p2  ;;  %p1021_p7 = scmp.lt.u32.totalorder %s1019_s21, %s1014_s11 }
  0x1a   : > { %p1023_p13 = scmp.lt.u32.totalorder %s1014_s11, %s1224_s6 }
  0x1b   : > { %p1018_p6 = pneg %p1017_p5  ;;  %p1022_p10 = por %p1021_p7, %p1020_p4 }
  0x1d   : > { %p1024_p12 = por %p1023_p13, %p1022_p10 }
  0x1f   : > { %p1025_p1 = pnand %p1024_p12, %p1018_p6 }
  0x21   : > { %1028 = shalt.err (!%p1025_p1)
}
  0x22   : > { %s1029_s28 = scalar_lea.vmem %s1226_s8, 1024  ;;  %s1128_s29 = smov [#allocation3]  }
  0x23   : > { %p1030_p2 = scmp.ne.s32.totalorder %s1226_s8, %s1029_s28  ;;  %s1034_s30 = sshll.u32 %s1128_s29, 4  ;;  %s1035_s30 = int_to_ptr.vmem [resolvable:$false] %s1034_s30 }
  0x24   : > { %s1036_s4 = scalar_lea.vmem %s1035_s30, 2048  ;;  %p1037_p9 = scmp.lt.s32.totalorder %s1226_s8, %s1035_s30 }
  0x25   : > { %p1032_p5 = pnand %p1030_p2, %p1016_p3  ;;  %p1038_p4 = scmp.lt.s32.totalorder %s1036_s4, %s1029_s28 }
  0x27   : > { %p1033_p11 = pneg %p1032_p5  ;;  %p1039_p7 = por %p1038_p4, %p1037_p9 }
  0x29   : > { %p1040_p10 = pnand %p1039_p7, %p1033_p11 }
  0x2b   : > { %1043 = shalt.err (!%p1040_p10)
}
  0x2c   : > { %s1129_s5 = smov 128   ;;  %s1130_s7 = smov 8  }
  0x2d   : > { %954 = dma.hbm_to_vmem [thread:$0]  (!%p1230_p0), %s1224_s6, 1024, %s1226_s8, %s1235_s10, %s1129_s5, %s1129_s5, %s1130_s7  }
  0x2e   : > { %p182_p12 = scmp.lt.s32.totalorder %s1126_s17, 3  ;;  %p1376_p1 = scmp.ge.s32.totalorder %s1126_s17, 1 }
  0x30   : > { %p183_p3 = pnand %p1376_p1, %p182_p12 }
  0x31   : > { %s1267_s11 = sand.u32 (!%p183_p3), 1, %s1110_s13  }
  0x32   : > { %186 = sbr.rel (%p183_p3) target bundleno = 786 (0x312), region = 32  ;;  %s879_s18 = sshll.u32 (!%p183_p3), %s1267_s11, 6 }
  0x33   : > { %s189_s19 = scalar_lea.sflag (!%p183_p3), [#allocation4], %s1267_s11  ;;  %s192_s21 = scalar_lea.vmem (!%p183_p3), [#allocation3], %s879_s18 }
  0x39   : > { %1097 = dma.done.wait (%p1202_p8), %s189_s19, 1024  }
  0x3a   : > { %1099 = vsyncadd (%p1202_p8), %s189_s19, 4294966272  ;;  %vm245_vm0 = vcmask 130048   ;;  %v243_v0 = vld [vmem:[%s1367_s1] sm:$0xff]  ;;  %v244_v1 = vld [vmem:[%s1367_s1 + $0x8] sm:$0xff]  ;;  %vm230_vm1 = vcmask 64512   ;;  %v1131_v24 = vmov 0.0  }
  0x3b   : > { %v235_v2 = vld [vmem:[%s192_s21] sm:$0xff]  ;;  %v941_v3 = vpack.c.bf16 %v244_v1, %v243_v0  ;;  %v241_v4 = vld [vmem:[%s192_s21 + $0x30] sm:$0xff]  ;;  %v236_v5 = vld [vmem:[%s192_s21 + $0x8] sm:$0xff]  ;;  %232 = vst.msk [vmem:[#allocation2 + $0x8] sm:$0xff] %vm230_vm1, %v1131_v24  ;;  %s880_s23 = sshll.u32 %s1267_s11, 5  ;;  %s901_s29 = sshll.u32 %s1118_s15, 9 }
  0x3c   : > { %921 = vmatprep.mubr.msk.f32.mxu0 %vm245_vm0, %v235_v2  ;;  %v242_v6 = vld [vmem:[%s192_s21 + $0x38] sm:$0xff]  ;;  %v237_v7 = vld [vmem:[%s192_s21 + $0x10] sm:$0xff]  ;;  %930 = vmatprep.mubr.msk.f32.mxu1 %vm245_vm0, %v241_v4  ;;  %v239_v9 = vld [vmem:[%s192_s21 + $0x20] sm:$0xff]  ;;  %231 = vst.msk [vmem:[#allocation2] sm:$0xff] %vm230_vm1, %v1131_v24  ;;  %s218_s28 = scalar_lea.vmem [#allocation6], %s880_s23  ;;  %s1313_s7 = scalar_lea.hbm %s1369_s3, %s901_s29 }
  0x3d   : > { %942 = vmatprep.subr.bf16.mxu0 %v941_v3  ;;  %945 = vmatprep.subr.bf16.mxu1 %v941_v3  ;;  %v238_v8 = vld [vmem:[%s192_s21 + $0x18] sm:$0xff]  ;;  %v240_v10 = vld [vmem:[%s192_s21 + $0x28] sm:$0xff]  ;;  %v379_v11 = vld [vmem:[%s1368_s2] sm:$0xff]  ;;  %233 = vst.msk [vmem:[#allocation2 + $0x10] sm:$0xff] %vm230_vm1, %v1131_v24  ;;  %s770_s30 = sshll.u32 %s218_s28, 4  ;;  %s757_s18 = scalar_lea.sflag [#allocation5], %s1267_s11  ;;  %s1315_s30 = int_to_ptr.vmem [resolvable:$true] %s770_s30 }
  0x3e   : > { %944 = vmatpush3.bf16.msra.mxu0 %v941_v3  ;;  %946 = vmatpush3.bf16.msra.mxu1 %v941_v3  ;;  %234 = vst.msk [vmem:[#allocation2 + $0x18] sm:$0xff] %vm230_vm1, %v1131_v24  ;;  %s1044_s19 = scalar_lea.vmem %s1315_s30, 512  ;;  %p1377_p9 = scmp.ne.s32.totalorder %s1373_s25, 0 }
  0x3f   : > { %933 = vmatprep.subr.msk.mxu1 %vm245_vm0, %v379_v11  ;;  %p1045_p8 = scmp.ne.s32.totalorder %s1315_s30, %s1044_s19  ;;  %s1132_s15 = smov [#allocation6]  }
  0x40   : > { %s1048_s21 = sshll.u32 %s1132_s15, 4  ;;  %s1049_s21 = int_to_ptr.vmem [resolvable:$false] %s1048_s21 }
  0x41   : > { %922 = vmatmul.mubr.msk.f32.vlgmr.msra.gmra.mrb[0].mxu0 %vm245_vm0, %v236_v5  ;;  %931 = vmatmul.mubr.msk.f32.vlgmr.msra.gmra.mrb[0].mxu1 %vm245_vm0, %v242_v6  ;;  %p1046_p11 = pnand %p1045_p8, %p1377_p9  ;;  %s1050_s6 = scalar_lea.vmem %s1049_s21, 1024 }
  0x42   : > { %924 = vmatprep.mubr.msk.f32.mxu0 %vm245_vm0, %v237_v7  ;;  %v376_v29 = vld [vmem:[#allocation2 + $0x8] sm:$0xff]  ;;  %p1051_p6 = scmp.lt.s32.totalorder %s1315_s30, %s1049_s21  ;;  %p1052_p13 = scmp.lt.s32.totalorder %s1050_s6, %s1044_s19 }
  0x43   : > { %v375_v30 = vld [vmem:[#allocation2] sm:$0xff]  ;;  %p1047_p0 = pneg %p1046_p11 }
  0x44   : > { %v377_v36 = vld [vmem:[#allocation2 + $0x10] sm:$0xff]  ;;  %p1053_p2 = por %p1052_p13, %p1051_p6 }
  0x45   : > { %925 = vmatmul.mubr.msk.f32.gmra.mrb[2].mxu0 %vm245_vm0, %v238_v8  ;;  %v378_v35 = vld [vmem:[#allocation2 + $0x18] sm:$0xff] }
  0x46   : > { %927 = vmatprep.mubr.msk.f32.mxu0 %vm245_vm0, %v239_v9  ;;  %p1054_p5 = pnand %p1053_p2, %p1047_p0 }
  0x47   : > { %934 = vmatpush3.xpose.msk.msra.mxu1 %vm245_vm0, %v379_v11 }
  0x49   : > { %928 = vmatmul.mubr.msk.f32.gmra.mrb[4].mxu0 %vm245_vm0, %v240_v10 }
 0x114   : > { %v923_v12 = vpop.f32.mrb[0].mxu0  ;;  %v932_v13 = vpop.f32.mrb[0].mxu1 }
 0x115   : > { %v336_v14 = vpop.f32.mrb[1].mxu0  ;;  %v366_v15 = vpop.f32.mrb[1].mxu1 }
 0x116   : > { %380 = vxpose.xlu0.b32.start [1/2] (short) (narrow) %v336_v14, 8 }
 0x118   : > { %v926_v16 = vpop.f32.mrb[2].mxu0 }
 0x119   : > { %v346_v17 = vpop.f32.mrb[3].mxu0 }
 0x11a   : > { %381 = vxpose.xlu0.b32.end [2/2] (short) (narrow) %v923_v12, 8  ;;  %412 = vxpose.xlu1.b32.start [1/2] (short) (narrow) %v346_v17, 8 }
 0x11c   : > { %v929_v18 = vpop.f32.mrb[4].mxu0 }
 0x11d   : > { %v356_v19 = vpop.f32.mrb[5].mxu0 }
 0x11e   : > { %413 = vxpose.xlu1.b32.end [2/2] (short) (narrow) %v926_v16, 8  ;;  %444 = vxpose.xlu0.b32.start [1/2] (short) (narrow) %v356_v19, 8 }
 0x122   : > { %476 = vxpose.xlu1.b32.start [1/2] (short) (narrow) %v366_v15, 8  ;;  %445 = vxpose.xlu0.b32.end [2/2] (short) (narrow) %v929_v18, 8 }
 0x126   : > { %477 = vxpose.xlu1.b32.end [2/2] (short) (narrow) %v932_v13, 8 }
 0x196   : > { %v396_v20 = vpop.trf.xlu0 }
 0x197   : > { %935 = vmatprep.mubr.msk.f32.mxu1 %vm245_vm0, %v396_v20 }
 0x19a   : > { %v428_v21 = vpop.trf.xlu1 }
 0x19b   : > { %936 = vmatmul.mubr.msk.f32.vlgmr.msra.gmra.mrb[2].mxu1 %vm245_vm0, %v428_v21 }
 0x19e   : > { %v460_v22 = vpop.trf.xlu0 }
 0x19f   : > { %938 = vmatprep.mubr.msk.f32.mxu1 %vm245_vm0, %v460_v22 }
 0x1a2   : > { %v492_v23 = vpop.trf.xlu1 }
 0x1a3   : > { %939 = vmatmul.mubr.msk.f32.gmra.mrb[4].mxu1 %vm245_vm0, %v492_v23 }
 0x26e   : > { %v937_v25 = vpop.f32.mrb[2].mxu1 }
 0x26f   : > { %v589_v26 = vpop.f32.mrb[3].mxu1  ;;  %640 = vxpose.xlu1.b32.start.end [1/1] (short) (narrow) %v937_v25, 8 }
 0x270   : > { %608 = vxpose.xlu0.b32.start.end [1/1] (short) (narrow) %v589_v26, 8 }
 0x276   : > { %v940_v27 = vpop.f32.mrb[4].mxu1 }
 0x277   : > { %704 = vxpose.xlu1.b32.start.end [1/1] (short) (narrow) %v940_v27, 8  ;;  %v599_v28 = vpop.f32.mrb[5].mxu1 }
 0x278   : > { %672 = vxpose.xlu0.b32.start.end [1/1] (short) (narrow) %v599_v28, 8 }
 0x2ef   : > { %v656_v31 = vpop.trf.xlu1 }
 0x2f0   : > { %v737_v32 = vadd.f32 %v656_v31, %v376_v29  ;;  %v624_v33 = vpop.trf.xlu0 }
 0x2f1   : > { %v736_v34 = vadd.f32 %v624_v33, %v375_v30 }
 0x2f2   : > { %742 = vst.msk [vmem:[#allocation2 + $0x8] sm:$0xff] %vm230_vm1, %v737_v32 }
 0x2f3   : > { %741 = vst.msk [vmem:[#allocation2] sm:$0xff] %vm230_vm1, %v736_v34 }
 0x2f7   : > { %v720_v37 = vpop.trf.xlu1 }
 0x2f8   : > { %v739_v38 = vadd.f32 %v720_v37, %v378_v35  ;;  %v688_v39 = vpop.trf.xlu0 }
 0x2f9   : > { %v738_v40 = vadd.f32 %v688_v39, %v377_v36  ;;  %v749_v41 = vld [vmem:[#allocation2 + $0x8] sm:$0xff] }
 0x2fa   : > { %744 = vst.msk [vmem:[#allocation2 + $0x18] sm:$0xff] %vm230_vm1, %v739_v38  ;;  %v748_v42 = vld [vmem:[#allocation2] sm:$0xff]  ;;  %753 = vst.msk [vmem:[%s218_s28 + $0x8] sm:$0xff] %vm230_vm1, %v749_v41 }
 0x2fb   : > { %743 = vst.msk [vmem:[#allocation2 + $0x10] sm:$0xff] %vm230_vm1, %v738_v40  ;;  %752 = vst.msk [vmem:[%s218_s28] sm:$0xff] %vm230_vm1, %v748_v42 }
 0x301   : > { %v751_v43 = vld [vmem:[#allocation2 + $0x18] sm:$0xff] }
 0x302   : > { %v750_v44 = vld [vmem:[#allocation2 + $0x10] sm:$0xff]  ;;  %755 = vst.msk [vmem:[%s218_s28 + $0x18] sm:$0xff] %vm230_vm1, %v751_v43 }
 0x303   : > { %754 = vst.msk [vmem:[%s218_s28 + $0x10] sm:$0xff] %vm230_vm1, %v750_v44 }
 0x304   : > { %1057 = shalt.err (!%p1054_p5)
}
 0x305   : > { %s1058_s8 = scalar_lea.hbm %s1313_s7, 512  ;;  %s1062_s24 = scalar_lea.hbm %s1369_s3, 1024 }
 0x306   : > { %p1059_p4 = scmp.ne.s32.totalorder %s1313_s7, %s1058_s8  ;;  %p1063_p12 = scmp.lt.u32.totalorder %s1313_s7, %s1369_s3 }
 0x307   : > { %p1064_p1 = scmp.lt.u32.totalorder %s1062_s24, %s1058_s8  ;;  %p1066_p8 = scmp.lt.u32.totalorder %s1058_s8, %s1313_s7 }
 0x308   : > { %p1060_p7 = pnand %p1059_p4, %p1377_p9 }
 0x309   : > { %p1065_p3 = por %p1064_p1, %p1063_p12 }
 0x30a   : > { %p1061_p10 = pneg %p1060_p7 }
 0x30b   : > { %p1067_p11 = por %p1066_p8, %p1065_p3 }
 0x30d   : > { %p1068_p0 = pnand %p1067_p11, %p1061_p10 }
 0x30f   : > { %1071 = shalt.err (!%p1068_p0)
}
 0x310   : > { %s1133_s28 = smov 128   ;;  %s1134_s29 = smov 8  }
 0x311   : > { %949 = dma.vmem_to_hbm [thread:$0]  (%p1377_p9), %s1315_s30, 512, %s1313_s7, %s757_s18, %s1133_s28, %s1133_s28, %s1134_s29  }
 0x312 PF: > { %s785_s4 = sand.u32 1, %s1106_s12   ;;  %p1378_p6 = scmp.ne.s32.totalorder %s1374_s27, 0 }
 0x313   : > { %p1379_p13 = scmp.ge.s32.totalorder %s1126_s17, 2  ;;  %s786_s5 = scalar_lea.sflag [#allocation5], %s785_s4 }
 0x315   : > { %p956_p2 = pnand %p1379_p13, %p1378_p6 }
 0x317   : > { %1101 = dma.done.wait (!%p956_p2), %s786_s5, 512  }
 0x318   : > { %1103 = vsyncadd (!%p956_p2), %s786_s5, 4294966784  ;;  %s19_s17 = sadd.s32 1, %s1126_s17   ;;  %s1380_s12 = smov %s1110_s13 }
 0x319   : > { %p16_p5 = scmp.ge.s32.totalorder %s19_s17, 4   ;;  %s1381_s13 = smov %s1114_s14 }
 0x31a   : > { %s1382_s14 = smov %s1211_s26  ;;  %s1383_s15 = smov %s1122_s16 }
 0x31b   : > { %s1384_s16 = smov %s1386_s20  ;;  %18 = sbr.rel (!%p16_p5) target bundleno = 6 (0x6), region = 88 }
 0x322   :  { %791 = vsyncpa [#allocation4], 1 }
 0x323   :  { %793 = vsyncpa [#allocation4 + $0x1], 1 }
 0x324   :  { %794 = vsyncpa [#allocation5], 1 }
 0x325   :  { %796 = vsyncpa [#allocation5 + $0x1], 1 }

</bundles_post_ra>
